<compile_context>
chip_gen: v6e
topology: v6e:2x2x1
jax: 0.10.0
libtpu: 0.0.40
codegen_flags: <defaults>
</compile_context>

<pallas_src>
import functools
import math

import jax
import jax.numpy as jnp
import numpy as np
from jax.experimental import pallas as pl
from jax.experimental.pallas import tpu as pltpu


def _round_up(x, m):
    return ((x + m - 1) // m) * m


def _ciou_loss_kernel(pred_ref, tgt_ref, iou_ref, loss_ref, *, loss_scale):
    """One (batch, N-tile) block.

    pred_ref: (1, 5, TN)  rows cx, cy, w, h, atan(w/h); boxes lane-dense.
    tgt_ref:  (1, X, 5)   targets on sublanes, coords on lanes.
    iou_ref:  (1, X, TN)  pairwise CIoU.
    loss_ref: (1, 1, TN)  per-anchor loss.
    """
    eps = 1e-7
    p = pred_ref[0]                       # (5, TN)
    t = tgt_ref[0]                        # (X, 5)

    x1, y1 = p[0:1, :], p[1:2, :]         # (1, TN)
    w1, h1 = p[2:3, :], p[3:4, :]
    a1 = p[4:5, :]                        # atan(w1/h1)
    x2, y2 = t[:, 0:1], t[:, 1:2]         # (X, 1)
    w2, h2 = t[:, 2:3], t[:, 3:4]
    a2 = t[:, 4:5]                        # atan(w2/h2)

    hw1, hh1 = w1 * 0.5, h1 * 0.5
    hw2, hh2 = w2 * 0.5, h2 * 0.5
    b1_x1, b1_x2 = x1 - hw1, x1 + hw1
    b1_y1, b1_y2 = y1 - hh1, y1 + hh1
    b2_x1, b2_x2 = x2 - hw2, x2 + hw2
    b2_y1, b2_y2 = y2 - hh2, y2 + hh2

    # Intersection / union: broadcast (X,1) vs (1,TN) -> (X,TN), lane-dense.
    inter_w = jnp.maximum(jnp.minimum(b1_x2, b2_x2) - jnp.maximum(b1_x1, b2_x1), 0.0)
    inter_h = jnp.maximum(jnp.minimum(b1_y2, b2_y2) - jnp.maximum(b1_y1, b2_y1), 0.0)
    inter = inter_w * inter_h
    union = w1 * h1 + w2 * h2 - inter + eps
    iou = inter / union

    # Enclosing-box diagonal + center distance (DIoU term).
    cw = jnp.maximum(b1_x2, b2_x2) - jnp.minimum(b1_x1, b2_x1)
    ch = jnp.maximum(b1_y2, b2_y2) - jnp.minimum(b1_y1, b2_y1)
    c2 = cw * cw + ch * ch + eps
    dx = x2 - x1
    dy = y2 - y1
    rho2 = dx * dx + dy * dy              # == ((b2x1+b2x2-b1x1-b1x2)^2 + ...)/4

    # Aspect-ratio consistency (CIoU term); rho2/c2 + v*alpha merged into one
    # divide: rho2/c2 + v^2/d == (rho2*d + v^2*c2) / (c2*d).
    da = a2 - a1
    v = (4.0 / (math.pi ** 2)) * (da * da)
    d = v - iou + (1.0 + eps)
    penalty = (rho2 * d + (v * v) * c2) / (c2 * d)
    ciou = iou - penalty                  # (X, TN)

    iou_ref[0] = ciou
    # loss = sum_x (1 - ciou) * weight / weight_sum, scalar-weight path folded
    # into a single precomputed multiplier.
    loss_ref[0] = jnp.sum(1.0 - ciou, axis=0, keepdims=True) * loss_scale


def aabb_bbox_loss(pred_bboxes, target_bboxes, target_scores=1,
                   iou_type="CIoU", tile_n=512):
    """Mirrors AABBboxLoss.forward (scalar / None target_scores paths).

    pred_bboxes:   [B, N, 4]  (cx, cy, w, h)
    target_bboxes: [B, X, 4]
    Returns (loss [B, N], ious [B, N, X]).
    """
    assert iou_type == "CIoU"
    assert tile_n % 128 == 0
    pred = pred_bboxes.astype(jnp.float32)
    tgt = target_bboxes.astype(jnp.float32)
    B, N, _ = pred.shape
    X = tgt.shape[-2]

    # check_target_scores: None -> weight=1, weight_sum=X; scalar s ->
    # weight=s, weight_sum=s*X. Either way the reduction is a single scale.
    if target_scores is None:
        loss_scale = 1.0 / X
    elif isinstance(target_scores, (int, float)):
        loss_scale = float(target_scores) / (float(target_scores) * X)
    else:
        raise NotImplementedError(
            "tensor-valued target_scores not implemented")  # TODO(synk)

    # Tile / pad N to a lane-aligned multiple so every tile is full (padding
    # boxes are valid unit boxes; padded rows are sliced off below).
    TN = min(tile_n, _round_up(N, 128))
    Np = _round_up(N, TN)
    if Np != N:
        pred = jnp.pad(pred, ((0, 0), (0, Np - N), (0, 0)), constant_values=1.0)

    pred_t = jnp.transpose(pred, (0, 2, 1))                         # [B, 4, Np]
    a1 = jnp.arctan(pred_t[:, 2:3, :] / pred_t[:, 3:4, :])          # [B, 1, Np]
    pred_in = jnp.concatenate([pred_t, a1], axis=1)                 # [B, 5, Np]
    a2 = jnp.arctan(tgt[..., 2] / tgt[..., 3])[..., None]           # [B, X, 1]
    tgt_in = jnp.concatenate([tgt, a2], axis=-1)                    # [B, X, 5]

    kernel = functools.partial(_ciou_loss_kernel, loss_scale=loss_scale)
    iou_xn, loss = pl.pallas_call(
        kernel,
        grid=(B, Np // TN),
        in_specs=[
            pl.BlockSpec((1, 5, TN), lambda b, n: (b, 0, n)),
            pl.BlockSpec((1, X, 5), lambda b, n: (b, 0, 0)),
        ],
        out_specs=[
            pl.BlockSpec((1, X, TN), lambda b, n: (b, 0, n)),
            pl.BlockSpec((1, 1, TN), lambda b, n: (b, 0, n)),
        ],
        out_shape=(
            jax.ShapeDtypeStruct((B, X, Np), jnp.float32),
            jax.ShapeDtypeStruct((B, 1, Np), jnp.float32),
        ),
        compiler_params=pltpu.CompilerParams(
            dimension_semantics=("parallel", "parallel")),
    )(pred_in, tgt_in)

    ious = jnp.transpose(iou_xn, (0, 2, 1))[:, :N, :]               # [B, N, X]
    return loss[:, 0, :N], ious


def _reference(pred, target, target_scores=1):
    """Pure-JAX transcription of the PyTorch forward (CIoU), for checking."""
    eps = 1e-7
    B, N, _ = pred.shape
    X = target.shape[-2]
    x1, y1, w1, h1 = [pred[..., i:i + 1] for i in range(4)]          # [B,N,1]
    ious = []
    for i in range(X):
        tb = target[..., i, :][..., None, :]                         # [B,1,4]
        x2, y2, w2, h2 = [tb[..., j:j + 1] for j in range(4)]        # [B,1,1]
        b1x1, b1x2, b1y1, b1y2 = x1 - w1 / 2, x1 + w1 / 2, y1 - h1 / 2, y1 + h1 / 2
        b2x1, b2x2, b2y1, b2y2 = x2 - w2 / 2, x2 + w2 / 2, y2 - h2 / 2, y2 + h2 / 2
        inter = (jnp.maximum(jnp.minimum(b1x2, b2x2) - jnp.maximum(b1x1, b2x1), 0.0) *
                 jnp.maximum(jnp.minimum(b1y2, b2y2) - jnp.maximum(b1y1, b2y1), 0.0))
        union = w1 * h1 + w2 * h2 - inter + eps
        iou = inter / union
        cw = jnp.maximum(b1x2, b2x2) - jnp.minimum(b1x1, b2x1)
        ch = jnp.maximum(b1y2, b2y2) - jnp.minimum(b1y1, b2y1)
        c2 = cw ** 2 + ch ** 2 + eps
        rho2 = ((b2x1 + b2x2 - b1x1 - b1x2) ** 2 + (b2y1 + b2y2 - b1y1 - b1y2) ** 2) / 4
        v = (4.0 / math.pi ** 2) * (jnp.arctan(w2 / h2) - jnp.arctan(w1 / h1)) ** 2
        alpha = v / (v - iou + (1.0 + eps))
        ious.append(iou - (rho2 / c2 + v * alpha))                   # [B,N,1]
    ious = jnp.concatenate(ious, axis=-1)                            # [B,N,X]
    weight = jnp.ones((B, X), jnp.float32) * float(target_scores)
    weight_sum = float(target_scores) * X
    loss = ((1.0 - ious) * weight[:, None, :]).sum(-1) / weight_sum
    return loss, ious


if __name__ == "__main__":
    key = jax.random.PRNGKey(0)
    k1, k2, k3, k4 = jax.random.split(key, 4)
    B, N, X = 2, 16, 4

    # Boxes in center-xywh format with strictly positive w, h.
    pred = jnp.concatenate(
        [jax.random.uniform(k1, (B, N, 2), jnp.float32, 0.0, 1.0),
         jax.random.uniform(k2, (B, N, 2), jnp.float32, 0.1, 0.6)], axis=-1)
    target = jnp.concatenate(
        [jax.random.uniform(k3, (B, X, 2), jnp.float32, 0.0, 1.0),
         jax.random.uniform(k4, (B, X, 2), jnp.float32, 0.1, 0.6)], axis=-1)

    loss, ious = aabb_bbox_loss(pred, target, target_scores=1, iou_type="CIoU")
    jax.block_until_ready((loss, ious))

    ref_loss, ref_ious = _reference(pred, target, target_scores=1)
    np.testing.assert_allclose(np.asarray(ious), np.asarray(ref_ious), rtol=1e-5, atol=1e-5)
    np.testing.assert_allclose(np.asarray(loss), np.asarray(ref_loss), rtol=1e-5, atol=1e-5)
    assert loss.shape == (B, N) and ious.shape == (B, N, X)

    print("KERNEL_OK")
</pallas_src>

<mosaic_0001>
module attributes {stable_mosaic.version = 11 : i64} {
  func.func @_ciou_loss_kernel(%arg0: i32, %arg1: i32, %arg2: memref<1x5x128xf32, #tpu.memory_space<vmem>>, %arg3: memref<1x4x5xf32, #tpu.memory_space<vmem>>, %arg4: memref<1x4x128xf32, #tpu.memory_space<vmem>>, %arg5: memref<1x1x128xf32, #tpu.memory_space<vmem>>) attributes {dimension_semantics = [#tpu.dimension_semantics<parallel>, #tpu.dimension_semantics<parallel>], iteration_bounds = array<i64: 2, 1>, scalar_prefetch = 0 : i64, scratch_operands = 0 : i64, tpu.core_type = #tpu.core_type<tc>, window_params = [{transform_indices = @transform_0, window_bounds = array<i64: 1, 5, 128>}, {transform_indices = @transform_1, window_bounds = array<i64: 1, 4, 5>}, {transform_indices = @transform_2, window_bounds = array<i64: 1, 4, 128>}, {transform_indices = @transform_3, window_bounds = array<i64: 1, 1, 128>}]} {
    %c0 = arith.constant 0 : index
    %c0_0 = arith.constant 0 : index
    %c0_1 = arith.constant 0 : index
    %0 = vector.load %arg2[%c0, %c0_0, %c0_1] : memref<1x5x128xf32, #tpu.memory_space<vmem>>, vector<1x5x128xf32>
    %1 = vector.shape_cast %0 : vector<1x5x128xf32> to vector<5x128xf32>
    %c0_2 = arith.constant 0 : index
    %c0_3 = arith.constant 0 : index
    %c0_4 = arith.constant 0 : index
    %2 = vector.load %arg3[%c0_2, %c0_3, %c0_4] : memref<1x4x5xf32, #tpu.memory_space<vmem>>, vector<1x4x5xf32>
    %3 = vector.shape_cast %2 : vector<1x4x5xf32> to vector<4x5xf32>
    %4 = vector.extract_strided_slice %1 {offsets = [0, 0], sizes = [1, 128], strides = [1, 1]} : vector<5x128xf32> to vector<1x128xf32>
    %5 = vector.extract_strided_slice %1 {offsets = [1, 0], sizes = [1, 128], strides = [1, 1]} : vector<5x128xf32> to vector<1x128xf32>
    %6 = vector.extract_strided_slice %1 {offsets = [2, 0], sizes = [1, 128], strides = [1, 1]} : vector<5x128xf32> to vector<1x128xf32>
    %7 = vector.extract_strided_slice %1 {offsets = [3, 0], sizes = [1, 128], strides = [1, 1]} : vector<5x128xf32> to vector<1x128xf32>
    %8 = vector.extract_strided_slice %1 {offsets = [4, 0], sizes = [1, 128], strides = [1, 1]} : vector<5x128xf32> to vector<1x128xf32>
    %9 = vector.extract_strided_slice %3 {offsets = [0, 0], sizes = [4, 1], strides = [1, 1]} : vector<4x5xf32> to vector<4x1xf32>
    %10 = vector.extract_strided_slice %3 {offsets = [0, 1], sizes = [4, 1], strides = [1, 1]} : vector<4x5xf32> to vector<4x1xf32>
    %11 = vector.extract_strided_slice %3 {offsets = [0, 2], sizes = [4, 1], strides = [1, 1]} : vector<4x5xf32> to vector<4x1xf32>
    %12 = vector.extract_strided_slice %3 {offsets = [0, 3], sizes = [4, 1], strides = [1, 1]} : vector<4x5xf32> to vector<4x1xf32>
    %13 = vector.extract_strided_slice %3 {offsets = [0, 4], sizes = [4, 1], strides = [1, 1]} : vector<4x5xf32> to vector<4x1xf32>
    %cst = arith.constant 5.000000e-01 : f32
    %14 = vector.broadcast %cst : f32 to vector<1x128xf32>
    %15 = arith.mulf %6, %14 : vector<1x128xf32>
    %cst_5 = arith.constant 5.000000e-01 : f32
    %16 = vector.broadcast %cst_5 : f32 to vector<1x128xf32>
    %17 = arith.mulf %7, %16 : vector<1x128xf32>
    %cst_6 = arith.constant 5.000000e-01 : f32
    %18 = vector.broadcast %cst_6 : f32 to vector<4x1xf32>
    %19 = arith.mulf %11, %18 : vector<4x1xf32>
    %cst_7 = arith.constant 5.000000e-01 : f32
    %20 = vector.broadcast %cst_7 : f32 to vector<4x1xf32>
    %21 = arith.mulf %12, %20 : vector<4x1xf32>
    %22 = arith.subf %4, %15 : vector<1x128xf32>
    %23 = arith.addf %4, %15 : vector<1x128xf32>
    %24 = arith.subf %5, %17 : vector<1x128xf32>
    %25 = arith.addf %5, %17 : vector<1x128xf32>
    %26 = arith.subf %9, %19 : vector<4x1xf32>
    %27 = arith.addf %9, %19 : vector<4x1xf32>
    %28 = arith.subf %10, %21 : vector<4x1xf32>
    %29 = arith.addf %10, %21 : vector<4x1xf32>
    %30 = vector.broadcast %23 : vector<1x128xf32> to vector<4x128xf32>
    %31 = vector.broadcast %27 : vector<4x1xf32> to vector<4x128xf32>
    %32 = arith.minimumf %30, %31 : vector<4x128xf32>
    %33 = vector.broadcast %22 : vector<1x128xf32> to vector<4x128xf32>
    %34 = vector.broadcast %26 : vector<4x1xf32> to vector<4x128xf32>
    %35 = arith.maximumf %33, %34 : vector<4x128xf32>
    %36 = arith.subf %32, %35 : vector<4x128xf32>
    %cst_8 = arith.constant 0.000000e+00 : f32
    %37 = vector.broadcast %cst_8 : f32 to vector<4x128xf32>
    %38 = arith.maximumf %36, %37 : vector<4x128xf32>
    %39 = vector.broadcast %25 : vector<1x128xf32> to vector<4x128xf32>
    %40 = vector.broadcast %29 : vector<4x1xf32> to vector<4x128xf32>
    %41 = arith.minimumf %39, %40 : vector<4x128xf32>
    %42 = vector.broadcast %24 : vector<1x128xf32> to vector<4x128xf32>
    %43 = vector.broadcast %28 : vector<4x1xf32> to vector<4x128xf32>
    %44 = arith.maximumf %42, %43 : vector<4x128xf32>
    %45 = arith.subf %41, %44 : vector<4x128xf32>
    %cst_9 = arith.constant 0.000000e+00 : f32
    %46 = vector.broadcast %cst_9 : f32 to vector<4x128xf32>
    %47 = arith.maximumf %45, %46 : vector<4x128xf32>
    %48 = arith.mulf %38, %47 : vector<4x128xf32>
    %49 = arith.mulf %6, %7 : vector<1x128xf32>
    %50 = arith.mulf %11, %12 : vector<4x1xf32>
    %51 = vector.broadcast %49 : vector<1x128xf32> to vector<4x128xf32>
    %52 = vector.broadcast %50 : vector<4x1xf32> to vector<4x128xf32>
    %53 = arith.addf %51, %52 : vector<4x128xf32>
    %54 = arith.subf %53, %48 : vector<4x128xf32>
    %cst_10 = arith.constant 1.000000e-07 : f32
    %55 = vector.broadcast %cst_10 : f32 to vector<4x128xf32>
    %56 = arith.addf %54, %55 : vector<4x128xf32>
    %57 = arith.divf %48, %56 : vector<4x128xf32>
    %58 = vector.broadcast %23 : vector<1x128xf32> to vector<4x128xf32>
    %59 = vector.broadcast %27 : vector<4x1xf32> to vector<4x128xf32>
    %60 = arith.maximumf %58, %59 : vector<4x128xf32>
    %61 = vector.broadcast %22 : vector<1x128xf32> to vector<4x128xf32>
    %62 = vector.broadcast %26 : vector<4x1xf32> to vector<4x128xf32>
    %63 = arith.minimumf %61, %62 : vector<4x128xf32>
    %64 = arith.subf %60, %63 : vector<4x128xf32>
    %65 = vector.broadcast %25 : vector<1x128xf32> to vector<4x128xf32>
    %66 = vector.broadcast %29 : vector<4x1xf32> to vector<4x128xf32>
    %67 = arith.maximumf %65, %66 : vector<4x128xf32>
    %68 = vector.broadcast %24 : vector<1x128xf32> to vector<4x128xf32>
    %69 = vector.broadcast %28 : vector<4x1xf32> to vector<4x128xf32>
    %70 = arith.minimumf %68, %69 : vector<4x128xf32>
    %71 = arith.subf %67, %70 : vector<4x128xf32>
    %72 = arith.mulf %64, %64 : vector<4x128xf32>
    %73 = arith.mulf %71, %71 : vector<4x128xf32>
    %74 = arith.addf %72, %73 : vector<4x128xf32>
    %cst_11 = arith.constant 1.000000e-07 : f32
    %75 = vector.broadcast %cst_11 : f32 to vector<4x128xf32>
    %76 = arith.addf %74, %75 : vector<4x128xf32>
    %77 = vector.broadcast %9 : vector<4x1xf32> to vector<4x128xf32>
    %78 = vector.broadcast %4 : vector<1x128xf32> to vector<4x128xf32>
    %79 = arith.subf %77, %78 : vector<4x128xf32>
    %80 = vector.broadcast %10 : vector<4x1xf32> to vector<4x128xf32>
    %81 = vector.broadcast %5 : vector<1x128xf32> to vector<4x128xf32>
    %82 = arith.subf %80, %81 : vector<4x128xf32>
    %83 = arith.mulf %79, %79 : vector<4x128xf32>
    %84 = arith.mulf %82, %82 : vector<4x128xf32>
    %85 = arith.addf %83, %84 : vector<4x128xf32>
    %86 = vector.broadcast %13 : vector<4x1xf32> to vector<4x128xf32>
    %87 = vector.broadcast %8 : vector<1x128xf32> to vector<4x128xf32>
    %88 = arith.subf %86, %87 : vector<4x128xf32>
    %89 = arith.mulf %88, %88 : vector<4x128xf32>
    %cst_12 = arith.constant 0.405284733 : f32
    %90 = vector.broadcast %cst_12 : f32 to vector<4x128xf32>
    %91 = arith.mulf %90, %89 : vector<4x128xf32>
    %92 = arith.subf %91, %57 : vector<4x128xf32>
    %cst_13 = arith.constant 1.00000012 : f32
    %93 = vector.broadcast %cst_13 : f32 to vector<4x128xf32>
    %94 = arith.addf %92, %93 : vector<4x128xf32>
    %95 = arith.mulf %85, %94 : vector<4x128xf32>
    %96 = arith.mulf %91, %91 : vector<4x128xf32>
    %97 = arith.mulf %96, %76 : vector<4x128xf32>
    %98 = arith.addf %95, %97 : vector<4x128xf32>
    %99 = arith.mulf %76, %94 : vector<4x128xf32>
    %100 = arith.divf %98, %99 : vector<4x128xf32>
    %101 = arith.subf %57, %100 : vector<4x128xf32>
    %c0_14 = arith.constant 0 : index
    %c0_15 = arith.constant 0 : index
    %c0_16 = arith.constant 0 : index
    %102 = vector.load %arg4[%c0_14, %c0_15, %c0_16] : memref<1x4x128xf32, #tpu.memory_space<vmem>>, vector<1x4x128xf32>
    %103 = vector.shape_cast %102 : vector<1x4x128xf32> to vector<4x128xf32>
    %104 = vector.shape_cast %101 : vector<4x128xf32> to vector<1x4x128xf32>
    tpu.vector_store %arg4[%c0_14, %c0_15, %c0_16], %104 {strides = array<i32>} : memref<1x4x128xf32, #tpu.memory_space<vmem>>, vector<1x4x128xf32>,
    %cst_17 = arith.constant 1.000000e+00 : f32
    %105 = vector.broadcast %cst_17 : f32 to vector<4x128xf32>
    %106 = arith.subf %105, %101 : vector<4x128xf32>
    %cst_18 = arith.constant dense<0.000000e+00> : vector<128xf32>
    %107 = vector.multi_reduction <add>, %106, %cst_18 [0] : vector<4x128xf32> to vector<128xf32>
    %108 = vector.shape_cast %107 : vector<128xf32> to vector<1x128xf32>
    %cst_19 = arith.constant 2.500000e-01 : f32
    %109 = vector.broadcast %cst_19 : f32 to vector<1x128xf32>
    %110 = arith.mulf %108, %109 : vector<1x128xf32>
    %c0_20 = arith.constant 0 : index
    %c0_21 = arith.constant 0 : index
    %c0_22 = arith.constant 0 : index
    %111 = vector.load %arg5[%c0_20, %c0_21, %c0_22] : memref<1x1x128xf32, #tpu.memory_space<vmem>>, vector<1x1x128xf32>
    %112 = vector.shape_cast %111 : vector<1x1x128xf32> to vector<1x128xf32>
    %113 = vector.shape_cast %110 : vector<1x128xf32> to vector<1x1x128xf32>
    tpu.vector_store %arg5[%c0_20, %c0_21, %c0_22], %113 {strides = array<i32>} : memref<1x1x128xf32, #tpu.memory_space<vmem>>, vector<1x1x128xf32>,
    return
  }
  func.func @transform_0(%arg0: i32, %arg1: i32) -> (i32, i32, i32) {
    %c0_i32 = arith.constant 0 : i32
    %c0_i32_0 = arith.constant 0 : i32
    return %arg0, %c0_i32, %arg1 : i32, i32, i32
  }
  func.func @transform_1(%arg0: i32, %arg1: i32) -> (i32, i32, i32) {
    %c0_i32 = arith.constant 0 : i32
    %c0_i32_0 = arith.constant 0 : i32
    %c0_i32_1 = arith.constant 0 : i32
    return %arg0, %c0_i32, %c0_i32_0 : i32, i32, i32
  }
  func.func @transform_2(%arg0: i32, %arg1: i32) -> (i32, i32, i32) {
    %c0_i32 = arith.constant 0 : i32
    %c0_i32_0 = arith.constant 0 : i32
    return %arg0, %c0_i32, %arg1 : i32, i32, i32
  }
  func.func @transform_3(%arg0: i32, %arg1: i32) -> (i32, i32, i32) {
    %c0_i32 = arith.constant 0 : i32
    %c0_i32_0 = arith.constant 0 : i32
    return %arg0, %c0_i32, %arg1 : i32, i32, i32
  }
}

</mosaic_0001>

<bundles_post_ra>
// kernel: tpu_custom_call.1
= control target key start
LH: loop header
LB: loop body
LE: loop exit
PB: predicated region body
PF: predicated region fallthrough
CT: control target
= control target key end

     0   :  { %9 = vsyncpa [#allocation3], 0  ;;  %s877_s0 = inlined_call_operand.vmem [shape: f32[2,5,128], index: 0, kind: input, shape index: {}]   ;;  %s878_s1 = inlined_call_operand.vmem [shape: f32[2,4,5], index: 1, kind: input, shape index: {}]   ;;  %s879_s2 = inlined_call_operand.hbm [shape: f32[2,4,128], index: 2, kind: output, shape index: {0}]   ;;  %s880_s3 = inlined_call_operand.hbm [shape: f32[2,1,128], index: 3, kind: output, shape index: {1}]  }
   0x1   :  { %11 = vsyncpa [#allocation3 + $0x1], 0 }
   0x2   :  { %12 = vsyncpa [#allocation5], 0 }
   0x3   :  { %14 = vsyncpa [#allocation5 + $0x1], 0  ;;  %s736_s12 = smov 0   ;;  %s738_s13 = smov 0  }
   0x4   :  { %s740_s14 = smov 0   ;;  %s742_s15 = smov 0  }
   0x5   :  { %s744_s16 = smov 0   ;;  %s746_s17 = smov 0  }
   0x6 LB: > { %s510_s18 = sadd.s32 4294967295, %s706_s17   ;;  %s511_s19 = sadd.s32 4294967294, %s706_s17   ;;  %s706_s17 = sphi %s746_s17, %s20_s17   ;;  %s702_s16 = sphi %s744_s16, %s887_s16   ;;  %s698_s15 = sphi %s742_s15, %s886_s15   ;;  %s694_s14 = sphi %s740_s14, %s885_s14   ;;  %s690_s13 = sphi %s738_s13, %s884_s13   ;;  %s686_s12 = sphi %s736_s12, %s883_s12  }
   0x7   : > { %s32_s20 = sadd.s32 1, %s702_s16  ;;  %s95_s21 = sadd.s32 1, %s694_s14 }
   0x8   : > { %p34_p0 = scmp.ge.s32.totalorder %s32_s20, 2  ;;  %p105_p1 = scmp.ne.s32.totalorder %s694_s14, %s690_s13 }
   0x9   : > { %p106_p2 = scmp.eq.s32.totalorder %s510_s18, 1  ;;  %p111_p3 = scmp.ne.s32.totalorder %s690_s13, %s686_s12 }
   0xa   : > { %s889_s20 = smov (%p34_p0, %s32_s20), 0  ;;  %p112_p5 = scmp.eq.s32.totalorder %s511_s19, 1 }
   0xb   : > { %p776_p4 = por %p106_p2, %p105_p1  ;;  %s90_s23 = ssub.s32 %s702_s16, %s889_s20 }
   0xc   : > { %p514_p6 = scmp.ge.s32.totalorder %s706_s17, 1  ;;  %p93_p7 = scmp.eq.s32.totalorder %s90_s23, 0 }
   0xd   : > { %p783_p8 = por %p112_p5, %p111_p3  ;;  %p175_p9 = scmp.lt.s32.totalorder %s706_s17, 3 }
   0xe   : > { %s789_s25 = scalar_select %p93_p7, %s694_s14, %s95_s21  }
   0xf   : > { %p176_p10 = pnand %p514_p6, %p175_p9 }
  0x10   : > { %p209_p11 = scmp.lt.s32.totalorder (!%p176_p10), %s698_s15, 1  ;;  %s710_s4 = smov (!%p176_p10), 126  }
  0x11   : > { %179 = sbr.rel (%p176_p10) target bundleno = 371 (0x173), region = 28  ;;  %s711_s5 = smov (!%p176_p10), 127  }
  0x12   : > { %s804_s10 = sand.u32 (!%p176_p10), 1, %s690_s13   ;;  %s519_s18 = sshll.u32 (!%p176_p10), %s698_s15, 6 }
  0x13   : > { %s515_s11 = sshll.u32 (!%p176_p10), %s804_s10, 2  ;;  %s366_s28 = scalar_lea.sflag (!%p176_p10), [#allocation3], %s804_s10 }
  0x14   : > { %s202_s19 = scalar_lea.vmem (!%p176_p10), [#allocation2], %s515_s11 }
  0x15   : > { %s384_s21 = sshll.u32 (!%p176_p10), %s202_s19, 4  ;;  %s813_s21 = int_to_ptr.vmem [resolvable:$true] %s384_s21 }
  0x16   : > { %v708_v0 = vmov 1   ;;  %v709_v1 = vmov 0   ;;  %s793_s26 = scalar_select %p209_p11, %s698_s15, 1  ;;  %v712_v7 = vmov 4   ;;  %v713_v10 = vmov 2  }
  0x17   : > { %590 = vset.pattern.permute.xlu0 %v708_v0  ;;  %589 = vset.pattern.permute.xlu1 %v709_v1  ;;  %v235_v12 = vlaneseq  ;;  %vm355_vm0 = vcmask 1043456   ;;  %s600_s29 = scalar_lea.vmem %s813_s21, 64 }
  0x18   : > { %s517_s27 = sshll.u32 %s793_s26, 2  ;;  %s516_s6 = sshll.u32 %s793_s26, 3 }
  0x19   : > { %s219_s30 = scalar_lea.vmem %s878_s1, %s517_s27  ;;  %s215_s9 = scalar_lea.vmem %s877_s0, %s516_s6  ;;  %v236_v14 = vshrl.u32 %v235_v12, 7 }
  0x1a   : > { %v221_v2 = vld [vmem:[%s219_s30] sm:$0xf]  ;;  %s811_s27 = scalar_lea.hbm %s879_s2, %s519_s18  ;;  %p601_p12 = scmp.ne.s32.totalorder %s813_s21, %s600_s29 }
  0x1b   : > { %v223_v3 = vmul.f32 0.5, %v221_v2  ;;  %v220_v11 = vld [vmem:[%s215_s9] sm:$0x1f]  ;;  %v237_v17 = vsub.s32 0, %v236_v14  ;;  %v259_v20 = vsub.s32 1, %v236_v14  ;;  %v289_v29 = vsub.s32 2, %v236_v14 }
  0x1c   : > { %v222_v13 = vmul.f32 0.5, %v220_v11  ;;  %v279_v22 = vrot.slane %v220_v11, 1  ;;  %v338_v44 = vsub.s32 4, %v236_v14  ;;  %p602_p13 = pnand %p601_p12, %p776_p4  ;;  %s714_s30 = smov [#allocation2]  }
  0x1d   : > { %230 = vrot.lane.b32.xlu0 %v223_v3, %s710_s4  ;;  %v318_v60 = vrot.slane %v220_v11, %v237_v17  ;;  %s604_s4 = sshll.u32 %s714_s30, 4  ;;  %s605_s4 = int_to_ptr.vmem [resolvable:$false] %s604_s4 }
  0x1e   : > { %v225_v15 = vrot.slane %v222_v13, 2  ;;  %v281_v30 = vmul.f32 %v279_v22, %v220_v11  ;;  %v339_v47 = vrot.slane %v220_v11, %v338_v44  ;;  %p603_p0 = pneg %p602_p13  ;;  %p607_p1 = scmp.lt.s32.totalorder %s813_s21, %s605_s4 }
  0x20   : > { %v227_v16 = vsub.f32 %v220_v11, %v225_v15  ;;  %v228_v19 = vadd.f32 %v225_v15, %v220_v11  ;;  %v290_v36 = vrot.slane %v281_v30, %v289_v29 }
  0x21   : > { %283 = vrot.lane.b32.xlu0 %v221_v2, %s711_s5  ;;  %s606_s5 = scalar_lea.vmem %s605_s4, 128 }
  0x22   : > { %v248_v21 = vrot.slane %v227_v16, %v237_v17  ;;  %v238_v23 = vrot.slane %v228_v19, %v237_v17  ;;  %v260_v25 = vrot.slane %v228_v19, %v259_v20  ;;  %v269_v27 = vrot.slane %v227_v16, %v259_v20  ;;  %p608_p2 = scmp.lt.s32.totalorder %s606_s5, %s600_s29 }
  0x24   : > { %p609_p3 = por %p608_p2, %p607_p1 }
  0x26   : > { %p610_p5 = pnand %p609_p3, %p603_p0 }
  0x8f   : > { %v231_v4 = vpop.permute.xlu0 %230 }
  0x90   : > { %v234_v5 = vadd.f32 %v231_v4, %v221_v2  ;;  %v233_v6 = vsub.f32 %v221_v2, %v231_v4 }
  0x92   : > { %262 = vperm.xlu0 %590, %v234_v5   ;;  %241 = vperm.xlu1 %589, %v234_v5  }
  0x93   : > { %v284_v8 = vpop.permute.xlu0 %283 }
  0x94   : > { %v286_v9 = vmul.f32 %v284_v8, %v221_v2 }
  0x96   : > { %251 = vperm.xlu1 %589, %v233_v6   ;;  %593 = vset.pattern.permute.xlu0 %v712_v7 }
  0x97   : > { %333 = vperm.xlu0 %593, %v221_v2  }
  0x9a   : > { %591 = vset.pattern.permute.xlu1 %v708_v0 }
  0x9b   : > { %271 = vperm.xlu1 %591, %v233_v6  }
  0x9f   : > { %592 = vset.pattern.permute.xlu1 %v713_v10 }
  0xa0   : > { %293 = vperm.xlu1 %592, %v286_v9  }
  0xa4   : > { %594 = vset.pattern.permute.xlu1 %v709_v1 }
  0xa5   : > { %312 = vperm.xlu1 %594, %v221_v2  }
  0xa9   : > { %595 = vset.pattern.permute.xlu1 %v708_v0  ;;  %v327_v0 = vrot.slane %v220_v11, %v259_v20 }
  0xaa   : > { %321 = vperm.xlu1 %595, %v221_v2  }
 0x10d   : > { %v242_v18 = vpop.permute.xlu1 %241  ;;  %v263_v28 = vpop.permute.xlu0 %262 }
 0x10e   : > { %v244_v31 = vmin.f32 %v238_v23, %v242_v18  ;;  %v265_v33 = vmin.f32 %v260_v25, %v263_v28  ;;  %v304_v49 = vmax.f32 %v260_v25, %v263_v28  ;;  %v301_v51 = vmax.f32 %v238_v23, %v242_v18 }
 0x111   : > { %v252_v24 = vpop.permute.xlu1 %251 }
 0x112   : > { %v254_v26 = vmax.f32 %v248_v21, %v252_v24  ;;  %v334_v48 = vpop.permute.xlu0 %333  ;;  %v302_v50 = vmin.f32 %v248_v21, %v252_v24 }
 0x113   : > { %v340_v53 = vsub.f32 %v334_v48, %v339_v47 }
 0x114   : > { %v255_v34 = vsub.f32 %v244_v31, %v254_v26  ;;  %v303_v54 = vsub.f32 %v301_v51, %v302_v50 }
 0x115   : > { %v341_v57 = vmul.f32 %v340_v53, %v340_v53 }
 0x116   : > { %v272_v32 = vpop.permute.xlu1 %271  ;;  %v256_v38 = vmax.f32 %v255_v34, 0.0  ;;  %v307_v58 = vmul.f32 %v303_v54, %v303_v54 }
 0x117   : > { %v274_v35 = vmax.f32 %v269_v27, %v272_v32  ;;  %v305_v46 = vmin.f32 %v269_v27, %v272_v32  ;;  %v342_v62 = vmul.f32 0.40528473, %v341_v57 }
 0x119   : > { %v275_v37 = vsub.f32 %v265_v33, %v274_v35  ;;  %v306_v52 = vsub.f32 %v304_v49, %v305_v46  ;;  %v346_v12 = vmul.f32 %v342_v62, %v342_v62 }
 0x11b   : > { %v276_v39 = vmax.f32 %v275_v37, 0.0  ;;  %v294_v40 = vpop.permute.xlu1 %293  ;;  %v308_v56 = vmul.f32 %v306_v52, %v306_v52 }
 0x11c   : > { %v296_v41 = vadd.f32 %v294_v40, %v290_v36 }
 0x11d   : > { %v277_v42 = vmul.f32 %v276_v39, %v256_v38  ;;  %v309_v61 = vadd.f32 %v308_v56, %v307_v58 }
 0x11f   : > { %v297_v43 = vsub.f32 %v296_v41, %v277_v42  ;;  %v310_v3 = vadd.f32 1e-07, %v309_v61 }
 0x120   : > { %v313_v55 = vpop.permute.xlu1 %312 }
 0x121   : > { %v298_v45 = vadd.f32 1e-07, %v297_v43  ;;  %v319_v4 = vsub.f32 %v313_v55, %v318_v60  ;;  %v347_v11 = vmul.f32 %v346_v12, %v310_v3 }
 0x123   : > { %596 = vrcp.f32 %v298_v45  ;;  %v329_v8 = vmul.f32 %v319_v4, %v319_v4 }
 0x125   : > { %v322_v1 = vpop.permute.xlu1 %321 }
 0x126   : > { %v328_v5 = vsub.f32 %v322_v1, %v327_v0 }
 0x128   : > { %v330_v9 = vmul.f32 %v328_v5, %v328_v5 }
 0x12a   : > { %v331_v10 = vadd.f32 %v330_v9, %v329_v8 }
 0x130   : > { %v597_v59 = vpop.eup %596 }
 0x131   : > { %v300_v63 = vmul.f32 %v597_v59, %v277_v42 }
 0x133   : > { %v343_v2 = vsub.f32 %v342_v62, %v300_v63 }
 0x135   : > { %v344_v6 = vadd.f32 1.0000001, %v343_v2 }
 0x137   : > { %v349_v7 = vmul.f32 %v344_v6, %v310_v3  ;;  %v345_v13 = vmul.f32 %v344_v6, %v331_v10 }
 0x139   : > { %598 = vrcp.f32 %v349_v7  ;;  %v348_v14 = vadd.f32 %v347_v11, %v345_v13 }
 0x146   : > { %v599_v15 = vpop.eup %598 }
 0x147   : > { %v351_v16 = vmul.f32 %v599_v15, %v348_v14 }
 0x149   : > { %v352_v17 = vsub.f32 %v300_v63, %v351_v16 }
 0x14b   : > { %353 = vst [vmem:[%s202_s19] sm:$0xf] %v352_v17  ;;  %v354_v18 = vsub.f32 1.0, %v352_v17 }
 0x14c   : > { %613 = shalt.err (!%p610_p5)
}
 0x14d   : > { %s614_s6 = scalar_lea.hbm %s811_s27, 64  ;;  %s618_s9 = scalar_lea.hbm %s879_s2, 128 }
 0x14e   : > { %p615_p6 = scmp.ne.s32.totalorder %s811_s27, %s614_s6  ;;  %p619_p10 = scmp.lt.s32.totalorder %s811_s27, %s879_s2 }
 0x14f   : > { %p620_p11 = scmp.lt.s32.totalorder %s618_s9, %s614_s6 }
 0x150   : > { %p616_p7 = pnand %p615_p6, %p776_p4 }
 0x151   : > { %p621_p12 = por %p620_p11, %p619_p10 }
 0x152   : > { %p617_p9 = pneg %p616_p7 }
 0x154   : > { %p622_p13 = pnand %p621_p12, %p617_p9 }
 0x156   : > { %625 = shalt.err (!%p622_p13)
}
 0x157   : > { %523 = dma.vmem_to_hbm [thread:$0]  (%p776_p4), %s813_s21, 64, %s811_s27, %s366_s28   ;;  %v356_v19 = vsel %vm355_vm0, %v354_v18, 0.0 }
 0x158   : > { %v357_v20 = vrot.slane %v356_v19, 4  ;;  %s520_s19 = sshll.u32 %s698_s15, 4  ;;  %s208_s23 = scalar_lea.vmem [#allocation4], %s804_s10 }
 0x159   : > { %s398_s26 = sshll.u32 %s208_s23, 4  ;;  %s396_s4 = scalar_lea.hbm %s880_s3, %s520_s19  ;;  %s399_s26 = int_to_ptr.vmem [resolvable:$true] %s398_s26 }
 0x15a   : > { %v358_v21 = vadd.f32 %v357_v20, %v356_v19  ;;  %s371_s21 = scalar_lea.sflag [#allocation5], %s804_s10  ;;  %s626_s27 = scalar_lea.vmem %s399_s26, 16 }
 0x15b   : > { %p627_p0 = scmp.ne.s32.totalorder %s399_s26, %s626_s27  ;;  %s715_s28 = smov [#allocation4]  }
 0x15c   : > { %v359_v22 = vrot.slane %v358_v21, 2  ;;  %s630_s5 = sshll.u32 %s715_s28, 4  ;;  %s631_s5 = int_to_ptr.vmem [resolvable:$false] %s630_s5 }
 0x15d   : > { %p628_p1 = pnand %p627_p0, %p776_p4  ;;  %s632_s15 = scalar_lea.vmem %s631_s5, 32 }
 0x15e   : > { %v360_v23 = vadd.f32 %v359_v22, %v358_v21  ;;  %p633_p3 = scmp.lt.s32.totalorder %s399_s26, %s631_s5  ;;  %p634_p5 = scmp.lt.s32.totalorder %s632_s15, %s626_s27 }
 0x15f   : > { %p629_p2 = pneg %p628_p1 }
 0x160   : > { %v361_v24 = vrot.slane %v360_v23, 1  ;;  %p635_p6 = por %p634_p5, %p633_p3 }
 0x162   : > { %v362_v25 = vadd.f32 %v361_v24, %v360_v23  ;;  %p636_p7 = pnand %p635_p6, %p629_p2 }
 0x164   : > { %v363_v26 = vmul.f32 0.25, %v362_v25 }
 0x166   : > { %364 = vst [vmem:[%s208_s23] sm:$0x1] %v363_v26 }
 0x167   : > { %639 = shalt.err (!%p636_p7)
}
 0x168   : > { %s640_s6 = scalar_lea.hbm %s396_s4, 16  ;;  %s644_s8 = scalar_lea.hbm %s880_s3, 32 }
 0x169   : > { %p641_p9 = scmp.ne.s32.totalorder %s396_s4, %s640_s6  ;;  %p645_p12 = scmp.lt.s32.totalorder %s396_s4, %s880_s3 }
 0x16a   : > { %p646_p13 = scmp.lt.s32.totalorder %s644_s8, %s640_s6 }
 0x16b   : > { %p642_p10 = pnand %p641_p9, %p776_p4 }
 0x16c   : > { %p647_p0 = por %p646_p13, %p645_p12 }
 0x16d   : > { %p643_p11 = pneg %p642_p10 }
 0x16f   : > { %p648_p1 = pnand %p647_p0, %p643_p11 }
 0x171   : > { %651 = shalt.err (!%p648_p1)
}
 0x172   : > { %524 = dma.vmem_to_hbm [thread:$0]  (%p776_p4), %s399_s26, 16, %s396_s4, %s371_s21  }
 0x173 PF: > { %p534_p2 = scmp.ge.s32.totalorder %s706_s17, 2  ;;  %s410_s18 = sand.u32 1, %s686_s12  }
 0x174   : > { %s411_s19 = scalar_lea.sflag [#allocation3], %s410_s18 }
 0x175   : > { %p528_p3 = pnand %p534_p2, %p783_p8 }
 0x177   : > { %p529_p5 = pneg %p528_p3 }
 0x179   : > { %677 = dma.done.wait (%p529_p5), %s411_s19, 64  }
 0x17a   : > { %679 = vsyncadd (%p529_p5), %s411_s19, 4294967232  ;;  %s420_s23 = scalar_lea.sflag [#allocation5], %s410_s18 }
 0x17b   : > { %681 = dma.done.wait (%p529_p5), %s420_s23, 16  }
 0x17c   : > { %683 = vsyncadd (%p529_p5), %s420_s23, 4294967280  ;;  %s20_s17 = sadd.s32 1, %s706_s17   ;;  %s883_s12 = smov %s690_s13 }
 0x17d   : > { %p17_p6 = scmp.ge.s32.totalorder %s20_s17, 4   ;;  %s884_s13 = smov %s694_s14 }
 0x17e   : > { %s885_s14 = smov %s789_s25  ;;  %s886_s15 = smov %s702_s16 }
 0x17f   : > { %s887_s16 = smov %s889_s20  ;;  %19 = sbr.rel (!%p17_p6) target bundleno = 6 (0x6), region = 83 }
 0x184   :  { %424 = vsyncpa [#allocation3], 1 }
 0x185   :  { %426 = vsyncpa [#allocation3 + $0x1], 1 }
 0x186   :  { %427 = vsyncpa [#allocation5], 1 }
 0x187   :  { %429 = vsyncpa [#allocation5 + $0x1], 1 }

</bundles_post_ra>
